<compile_context>
chip_gen: v7x
topology: tpu7x:2x2x1
jax: 0.10.0
libtpu: 0.0.40
codegen_flags: <defaults>
</compile_context>

<pallas_src>
import jax
import jax.numpy as jnp
from jax.experimental import pallas as pl
from jax.experimental.pallas import tpu as pltpu


def _identity_alias_kernel(x_ref, o_ref, flag_ref):
    # Output aliases input: nothing to move.  Neither HBM ref is dereferenced,
    # so no DMA, no VMEM traffic and no vld/vst bundle slots are spent.  The
    # scalar SMEM store is a near-free marker keeping the body non-trivial.
    del x_ref, o_ref
    flag_ref[0] = jnp.int32(1)


def core_forward(x):
    """Pallas implementation of Core.forward(x) == x (zero-copy identity)."""
    x = jnp.asarray(x)
    if x.ndim == 0 or x.size == 0:
        # Degenerate shapes: nothing for a kernel to do.
        return x

    return pl.pallas_call(
        _identity_alias_kernel,
        out_shape=jax.ShapeDtypeStruct(x.shape, x.dtype),
        in_specs=[pl.BlockSpec(memory_space=pl.ANY)],
        out_specs=pl.BlockSpec(memory_space=pl.ANY),
        scratch_shapes=[pltpu.SMEM((1,), jnp.int32)],
        # Identity: the output HBM buffer IS the input HBM buffer.  Under jit
        # with an intermediate/donatable input this costs zero HBM traffic; at
        # worst XLA inserts a single full-bandwidth device copy, which is still
        # strictly cheaper than the previous HBM->VMEM->HBM staged pipeline and
        # far cheaper than the old padded path (which tripled traffic).
        input_output_aliases={0: 0},
    )(x)


if __name__ == "__main__":
    key = jax.random.PRNGKey(0)
    # Core(in_nodes) has no parameters and forward is identity; use a small
    # NCHW-like input consistent with typical usage.
    x = jax.random.normal(key, (2, 4, 16, 16), dtype=jnp.float32)

    y = core_forward(x)
    y = jax.block_until_ready(y)

    assert y.shape == x.shape and y.dtype == x.dtype
    assert bool(jnp.all(y == x))
    print("KERNEL_OK")
</pallas_src>

<mosaic_0001>
module attributes {stable_mosaic.version = 11 : i64} {
  func.func @_identity_alias_kernel(%arg0: memref<2x4x16x16xf32, #tpu.memory_space<any>>, %arg1: memref<2x4x16x16xf32, #tpu.memory_space<any>>, %arg2: memref<1xi32, #tpu.memory_space<smem>>) attributes {dimension_semantics = [], scalar_prefetch = 0 : i64, scratch_operands = 1 : i64, tpu.core_type = #tpu.core_type<tc>} {
    %c1_i32 = arith.constant 1 : i32
    %c0 = arith.constant 0 : index
    %0 = memref.load %arg2[%c0] : memref<1xi32, #tpu.memory_space<smem>>
    memref.store %c1_i32, %arg2[%c0] : memref<1xi32, #tpu.memory_space<smem>>
    return
  }
}

</mosaic_0001>

<bundles_post_ra>
// kernel: tpu_custom_call.1
= control target key start
LH: loop header
LB: loop body
LE: loop exit
PB: predicated region body
PF: predicated region fallthrough
CT: control target
= control target key end

     0   :  { %s18_s0 = inlined_call_operand.hbm [shape: f32[2,4,16,16], index: 0, kind: input, shape index: {}, may-alias: {0,1}]   ;;  %s19_s1 = inlined_call_operand.hbm [shape: f32[2,4,16,16], index: 1, kind: output, shape index: {}, may-alias: {0,1}]  }

</bundles_post_ra>
